<compile_context>
chip_gen: v7x
topology: tpu7x:2x2x1
jax: 0.10.0
libtpu: 0.0.40
codegen_flags: <defaults>
</compile_context>

<pallas_src>
import functools

import jax
import jax.numpy as jnp
from jax.experimental import pallas as pl
from jax.experimental.pallas import tpu as pltpu

LANE = 128


def _round_up(v, m):
    return (v + m - 1) // m * m


def _edge_node_kernel(
    # resident graph inputs
    x_ref, counts_ref,
    # per-edge-tile inputs
    row_ref, col_ref, ea_ref,
    # fused layer-1 weights (edge_mlp1 & node_mlp1 first Lin share src/ea)
    w1_src_ref, w1_dst_ref, w1_ea_ref, b1_ref,
    # edge_mlp1 second Lin (lane-padded), node_mlp1 second Lin (lane-padded)
    we2_ref, be2_ref, wn1b_ref, bn1b_ref,
    # node_mlp2 (first Lin split by cat segments; all lane-padded)
    wn2_x_ref, wn2_m_ref, bn2_ref, wn2b_ref, bn2b_ref,
    # outputs
    node_out_ref, edge_out_ref,
    # scratch: scatter-sum accumulator, persists across edge tiles
    seg_ref,
    *, hidden_pad, compute_dtype,
):
    f32 = jnp.float32
    i = pl.program_id(0)
    nsteps = pl.num_programs(0)

    @pl.when(i == 0)
    def _init():
        seg_ref[...] = jnp.zeros_like(seg_ref)

    x = x_ref[...]                       # [N, nodef] f32
    ea = ea_ref[...]                     # [TE, edgef] f32
    row = row_ref[...]                   # [TE, 1] int32 (padded edges carry index N)
    col = col_ref[...]                   # [TE, 1] int32
    N = x.shape[0]
    TE = ea.shape[0]

    # --- fused gather: one [2*TE, N] one-hot matmul yields x[row] and x[col] ---
    idx = jnp.concatenate([row, col], axis=0)                       # [2*TE, 1]
    iota_n = jax.lax.broadcasted_iota(jnp.int32, (2 * TE, N), 1)
    gather_oh = (iota_n == idx).astype(compute_dtype)               # [2*TE, N]
    gathered = jnp.dot(gather_oh, x.astype(compute_dtype),
                       preferred_element_type=f32)                  # [2*TE, nodef]
    src = gathered[:TE]                                             # x[row]
    dest = gathered[TE:]                                            # x[col]

    # --- fused first layer of edge_mlp1 and node_mlp1 (shared src / edge_attr) ---
    h_shared = (jnp.dot(src, w1_src_ref[...], preferred_element_type=f32)
                + jnp.dot(ea, w1_ea_ref[...], preferred_element_type=f32)
                + b1_ref[...])                                      # [TE, 2*hidden_pad]
    h_edge = jnp.maximum(
        h_shared[:, :hidden_pad]
        + jnp.dot(dest, w1_dst_ref[...], preferred_element_type=f32), 0.0)
    h_msg = jnp.maximum(h_shared[:, hidden_pad:], 0.0)

    # --- edge = second Lin of edge_mlp1 (lane-dense [TE, edge_pad_dim]) ---
    edge_out_ref[...] = (jnp.dot(h_edge, we2_ref[...], preferred_element_type=f32)
                         + be2_ref[...])

    # --- msg = second Lin of node_mlp1 (lane-dense [TE, msg_pad]) ---
    msg = jnp.dot(h_msg, wn1b_ref[...], preferred_element_type=f32) + bn1b_ref[...]

    # --- scatter-add over col: contract the edge axis directly (no transpose) ---
    col_oh = gather_oh[TE:]                                         # [TE, N]
    seg_ref[...] += jax.lax.dot_general(
        col_oh, msg.astype(compute_dtype),
        dimension_numbers=(((0,), (0,)), ((), ())),
        preferred_element_type=f32)                                 # [N, msg_pad]

    # --- last edge tile: finish scatter_mean and run node_mlp2 ---
    @pl.when(i == nsteps - 1)
    def _finalize():
        seg_mean = seg_ref[...] / counts_ref[...]                   # counts pre-clamped >= 1
        hh = jnp.maximum(
            jnp.dot(x, wn2_x_ref[...], preferred_element_type=f32)
            + jnp.dot(seg_mean, wn2_m_ref[...], preferred_element_type=f32)
            + bn2_ref[...], 0.0)
        node_out_ref[...] = (jnp.dot(hh, wn2b_ref[...], preferred_element_type=f32)
                             + bn2b_ref[...])                       # lane-dense [N, node_pad]


def init_params(key, edgef_dim, nodef_dim, hidden_dim, edge_last_dim, node_last_dim):
    """Deterministic synthetic parameters. Weights stored as [in, out]; biases as [1, out]."""
    ks = jax.random.split(key, 12)

    def lin(kw, kb, din, dout):
        w = jax.random.normal(kw, (din, dout), jnp.float32) * (1.0 / jnp.sqrt(din))
        b = jax.random.normal(kb, (1, dout), jnp.float32) * 0.01
        return w, b

    we1, be1 = lin(ks[0], ks[1], 2 * nodef_dim + edgef_dim, hidden_dim)
    we2, be2 = lin(ks[2], ks[3], hidden_dim, edge_last_dim)
    wn1, bn1 = lin(ks[4], ks[5], nodef_dim + edgef_dim, hidden_dim)
    wn1b, bn1b = lin(ks[6], ks[7], hidden_dim, nodef_dim + edgef_dim)
    wn2, bn2 = lin(ks[8], ks[9], 2 * nodef_dim + edgef_dim, hidden_dim)
    wn2b, bn2b = lin(ks[10], ks[11], hidden_dim, node_last_dim)
    return dict(we1=we1, be1=be1, we2=we2, be2=be2,
                wn1=wn1, bn1=bn1, wn1b=wn1b, bn1b=bn1b,
                wn2=wn2, bn2=bn2, wn2b=wn2b, bn2b=bn2b)


def _pad2(w, rows, cols):
    return jnp.pad(w, ((0, rows - w.shape[0]), (0, cols - w.shape[1])))


@functools.partial(jax.jit, static_argnames=("tile_e", "compute_dtype"))
def edge_node_model(x, edge_index, edge_attr, params, *,
                    tile_e=256, compute_dtype=jnp.bfloat16):
    x = x.astype(jnp.float32)
    edge_attr = edge_attr.astype(jnp.float32)
    N, nodef = x.shape
    E, edgef = edge_attr.shape
    p = params
    hidden = p["we1"].shape[1]
    msgdim = p["wn1b"].shape[1]          # nodef + edgef
    edge_last = p["we2"].shape[1]
    node_last = p["wn2b"].shape[1]

    # ---- lane-padded inner / output dims (exact zero padding) ----
    hidden_pad = _round_up(hidden, LANE)
    msg_pad = _round_up(msgdim, LANE)
    edge_pad_dim = _round_up(edge_last, LANE)
    node_pad_dim = _round_up(node_last, LANE)

    # ---- edge tiling ----
    te = _round_up(min(int(tile_e), _round_up(E, 8)), 8)
    e_pad = _round_up(E, te)
    grid = (e_pad // te,)

    row = edge_index[0].astype(jnp.int32)
    col = edge_index[1].astype(jnp.int32)

    # counts (scatter_mean denominator) precomputed as tiny [N, 1] input (exact).
    counts = jnp.zeros((N,), jnp.float32).at[col].add(1.0)
    counts = jnp.maximum(counts, 1.0).reshape(N, 1)

    # Pad edges: index N is out of range -> all-zero one-hot row -> no contribution.
    pad_e = e_pad - E
    row_p = jnp.pad(row, (0, pad_e), constant_values=N).reshape(e_pad, 1)
    col_p = jnp.pad(col, (0, pad_e), constant_values=N).reshape(e_pad, 1)
    ea_p = jnp.pad(edge_attr, ((0, pad_e), (0, 0)))

    # Split cat-segment weights (plain-JAX glue; no compute) and lane-pad them.
    we1_src, we1_dst, we1_ea = p["we1"][:nodef], p["we1"][nodef:2 * nodef], p["we1"][2 * nodef:]
    wn1_x, wn1_ea = p["wn1"][:nodef], p["wn1"][nodef:]
    wn2_x, wn2_m = p["wn2"][:nodef], p["wn2"][nodef:]

    # Fused layer-1 weights: [edge_mlp1 | node_mlp1] along the (padded) output axis.
    w1_src = jnp.concatenate([_pad2(we1_src, nodef, hidden_pad),
                              _pad2(wn1_x, nodef, hidden_pad)], axis=1)      # [nodef, 2*Hp]
    w1_ea = jnp.concatenate([_pad2(we1_ea, edgef, hidden_pad),
                             _pad2(wn1_ea, edgef, hidden_pad)], axis=1)      # [edgef, 2*Hp]
    b1 = jnp.concatenate([_pad2(p["be1"], 1, hidden_pad),
                          _pad2(p["bn1"], 1, hidden_pad)], axis=1)           # [1, 2*Hp]
    w1_dst = _pad2(we1_dst, nodef, hidden_pad)                               # [nodef, Hp]

    we2_p = _pad2(p["we2"], hidden_pad, edge_pad_dim)
    be2_p = _pad2(p["be2"], 1, edge_pad_dim)
    wn1b_p = _pad2(p["wn1b"], hidden_pad, msg_pad)
    bn1b_p = _pad2(p["bn1b"], 1, msg_pad)

    wn2_x_p = _pad2(wn2_x, nodef, hidden_pad)
    wn2_m_p = _pad2(wn2_m, msg_pad, hidden_pad)
    bn2_p = _pad2(p["bn2"], 1, hidden_pad)
    wn2b_p = _pad2(p["wn2b"], hidden_pad, node_pad_dim)
    bn2b_p = _pad2(p["bn2b"], 1, node_pad_dim)

    args = (x, counts, row_p, col_p, ea_p,
            w1_src, w1_dst, w1_ea, b1,
            we2_p, be2_p, wn1b_p, bn1b_p,
            wn2_x_p, wn2_m_p, bn2_p, wn2b_p, bn2b_p)

    def whole(a):
        nd = a.ndim
        return pl.BlockSpec(a.shape, lambda *_: (0,) * nd)

    def tiled(last_dim):
        return pl.BlockSpec((te, last_dim), lambda i: (i, 0))

    in_specs = [
        whole(x), whole(counts),
        tiled(1), tiled(1), tiled(edgef),
        whole(w1_src), whole(w1_dst), whole(w1_ea), whole(b1),
        whole(we2_p), whole(be2_p), whole(wn1b_p), whole(bn1b_p),
        whole(wn2_x_p), whole(wn2_m_p), whole(bn2_p), whole(wn2b_p), whole(bn2b_p),
    ]
    out_specs = [
        pl.BlockSpec((N, node_pad_dim), lambda i: (0, 0)),    # node out: resident across tiles
        pl.BlockSpec((te, edge_pad_dim), lambda i: (i, 0)),   # edge out: streamed per tile
    ]

    # ---- VMEM budget (sized from actual per-tile buffers, clamped for v7x) ----
    itemsize_c = jnp.dtype(compute_dtype).itemsize
    weight_bytes = sum(int(a.size) * a.dtype.itemsize for a in args[5:])
    resident_bytes = (N * nodef + N + N * node_pad_dim + N * msg_pad) * 4
    tile_io_bytes = 2 * te * (2 * 4 + edgef * 4 + edge_pad_dim * 4)      # double-buffered
    work_bytes = (2 * te * N * itemsize_c
                  + te * (2 * nodef + 3 * hidden_pad + msg_pad + edge_pad_dim) * 4)
    vmem_limit = int(min(64 * 2 ** 20,
                         max(32 * 2 ** 20,
                             3 * (weight_bytes + resident_bytes + tile_io_bytes + work_bytes))))

    # ---- cost estimate: dominated by the E*N one-hot gather/scatter MACs ----
    flops = int(
        2 * e_pad * N * (2 * nodef + msg_pad)
        + 2 * e_pad * ((nodef + edgef) * 2 * hidden_pad + nodef * hidden_pad
                       + hidden_pad * edge_pad_dim + hidden_pad * msg_pad)
        + 2 * N * ((nodef + msg_pad) * hidden_pad + hidden_pad * node_pad_dim))
    bytes_accessed = int(sum(int(a.size) * a.dtype.itemsize for a in args)
                         + N * node_pad_dim * 4 + e_pad * edge_pad_dim * 4)

    kernel = functools.partial(_edge_node_kernel,
                               hidden_pad=hidden_pad, compute_dtype=compute_dtype)
    node_p, edge_p = pl.pallas_call(
        kernel,
        out_shape=(jax.ShapeDtypeStruct((N, node_pad_dim), jnp.float32),
                   jax.ShapeDtypeStruct((e_pad, edge_pad_dim), jnp.float32)),
        grid_spec=pltpu.PrefetchScalarGridSpec(
            num_scalar_prefetch=0,
            grid=grid,
            in_specs=in_specs,
            out_specs=out_specs,
            scratch_shapes=[pltpu.VMEM((N, msg_pad), jnp.float32)],
        ),
        compiler_params=pltpu.CompilerParams(
            # The edge-tile axis carries the scatter accumulation -> reduction axis.
            dimension_semantics=("arbitrary",),
            vmem_limit_bytes=vmem_limit,
        ),
        cost_estimate=pl.CostEstimate(flops=flops, transcendentals=0,
                                      bytes_accessed=bytes_accessed),
    )(*args)

    return node_p[:, :node_last], edge_p[:E, :edge_last]


def reference(x, edge_index, edge_attr, p):
    """Pure-JAX mirror of the PyTorch forward, for verification."""
    row, col = edge_index[0], edge_index[1]
    src, dest = x[row], x[col]

    def mlp(inp, w1, b1, w2, b2):
        h = jnp.maximum(inp @ w1 + b1, 0.0)
        return h @ w2 + b2

    edge = mlp(jnp.concatenate([src, dest, edge_attr], axis=1),
               p["we1"], p["be1"], p["we2"], p["be2"])
    msg = mlp(jnp.concatenate([src, edge_attr], axis=1),
              p["wn1"], p["bn1"], p["wn1b"], p["bn1b"])
    N = x.shape[0]
    seg_sum = jnp.zeros((N, msg.shape[1]), jnp.float32).at[col].add(msg)
    counts = jnp.zeros((N,), jnp.float32).at[col].add(1.0)
    seg_mean = seg_sum / jnp.maximum(counts, 1.0)[:, None]
    node = mlp(jnp.concatenate([x, seg_mean], axis=1),
               p["wn2"], p["bn2"], p["wn2b"], p["bn2b"])
    return node, edge


if __name__ == "__main__":
    # small shapes implied by the forward pass (E deliberately not a tile multiple)
    N = 8
    E = 20
    nodef_dim = 8
    edgef_dim = 4
    hidden_dim = 32
    edge_last_dim = 8
    node_last_dim = 8

    key = jax.random.PRNGKey(0)
    k_x, k_ei, k_ea, k_p = jax.random.split(key, 4)
    x = jax.random.normal(k_x, (N, nodef_dim), jnp.float32)
    edge_index = jax.random.randint(k_ei, (2, E), 0, N, dtype=jnp.int32)
    edge_attr = jax.random.normal(k_ea, (E, edgef_dim), jnp.float32)
    params = init_params(k_p, edgef_dim, nodef_dim, hidden_dim,
                         edge_last_dim, node_last_dim)

    node_ref, edge_ref = reference(x, edge_index, edge_attr, params)

    # 1) f32 one-hot path: strict check (exercises multi-tile grid + padding).
    node, edge = edge_node_model(x, edge_index, edge_attr, params,
                                 tile_e=8, compute_dtype=jnp.float32)
    jax.block_until_ready((node, edge))
    assert node.shape == (N, node_last_dim) and edge.shape == (E, edge_last_dim)
    assert jnp.allclose(node, node_ref, atol=1e-4, rtol=1e-4)
    assert jnp.allclose(edge, edge_ref, atol=1e-4, rtol=1e-4)

    # 2) bf16 one-hot path (default; full MXU rate on v6e/v7x) — only the gathered
    #    x values / scattered msg values see bf16 rounding, so a looser tolerance.
    node_bf, edge_bf = edge_node_model(x, edge_index, edge_attr, params, tile_e=8)
    jax.block_until_ready((node_bf, edge_bf))
    assert jnp.allclose(node_bf, node_ref, atol=5e-2, rtol=5e-2)
    assert jnp.allclose(edge_bf, edge_ref, atol=5e-2, rtol=5e-2)

    print("KERNEL_OK")
</pallas_src>

<mosaic_0001>
module attributes {stable_mosaic.version = 11 : i64} {
  func.func @_edge_node_kernel(%arg0: i32, %arg1: memref<8x8xf32, #tpu.memory_space<vmem>>, %arg2: memref<8x1xf32, #tpu.memory_space<vmem>>, %arg3: memref<8x1xi32, #tpu.memory_space<vmem>>, %arg4: memref<8x1xi32, #tpu.memory_space<vmem>>, %arg5: memref<8x4xf32, #tpu.memory_space<vmem>>, %arg6: memref<8x256xf32, #tpu.memory_space<vmem>>, %arg7: memref<8x128xf32, #tpu.memory_space<vmem>>, %arg8: memref<4x256xf32, #tpu.memory_space<vmem>>, %arg9: memref<1x256xf32, #tpu.memory_space<vmem>>, %arg10: memref<128x128xf32, #tpu.memory_space<vmem>>, %arg11: memref<1x128xf32, #tpu.memory_space<vmem>>, %arg12: memref<128x128xf32, #tpu.memory_space<vmem>>, %arg13: memref<1x128xf32, #tpu.memory_space<vmem>>, %arg14: memref<8x128xf32, #tpu.memory_space<vmem>>, %arg15: memref<128x128xf32, #tpu.memory_space<vmem>>, %arg16: memref<1x128xf32, #tpu.memory_space<vmem>>, %arg17: memref<128x128xf32, #tpu.memory_space<vmem>>, %arg18: memref<1x128xf32, #tpu.memory_space<vmem>>, %arg19: memref<8x128xf32, #tpu.memory_space<vmem>>, %arg20: memref<8x128xf32, #tpu.memory_space<vmem>>, %arg21: memref<8x128xf32, #tpu.memory_space<vmem>>) attributes {dimension_semantics = [#tpu.dimension_semantics<arbitrary>], iteration_bounds = array<i64: 3>, scalar_prefetch = 0 : i64, scratch_operands = 1 : i64, tpu.core_type = #tpu.core_type<tc>, window_params = [{pipeline_mode = #tpu.pipeline_mode<synchronous>, transform_indices = @transform_0, window_bounds = array<i64: 8, 8>}, {pipeline_mode = #tpu.pipeline_mode<synchronous>, transform_indices = @transform_1, window_bounds = array<i64: 8, 1>}, {transform_indices = @transform_2, window_bounds = array<i64: 8, 1>}, {transform_indices = @transform_3, window_bounds = array<i64: 8, 1>}, {transform_indices = @transform_4, window_bounds = array<i64: 8, 4>}, {pipeline_mode = #tpu.pipeline_mode<synchronous>, transform_indices = @transform_5, window_bounds = array<i64: 8, 256>}, {pipeline_mode = #tpu.pipeline_mode<synchronous>, transform_indices = @transform_6, window_bounds = array<i64: 8, 128>}, {pipeline_mode = #tpu.pipeline_mode<synchronous>, transform_indices = @transform_7, window_bounds = array<i64: 4, 256>}, {pipeline_mode = #tpu.pipeline_mode<synchronous>, transform_indices = @transform_8, window_bounds = array<i64: 1, 256>}, {pipeline_mode = #tpu.pipeline_mode<synchronous>, transform_indices = @transform_9, window_bounds = array<i64: 128, 128>}, {pipeline_mode = #tpu.pipeline_mode<synchronous>, transform_indices = @transform_10, window_bounds = array<i64: 1, 128>}, {pipeline_mode = #tpu.pipeline_mode<synchronous>, transform_indices = @transform_11, window_bounds = array<i64: 128, 128>}, {pipeline_mode = #tpu.pipeline_mode<synchronous>, transform_indices = @transform_12, window_bounds = array<i64: 1, 128>}, {pipeline_mode = #tpu.pipeline_mode<synchronous>, transform_indices = @transform_13, window_bounds = array<i64: 8, 128>}, {pipeline_mode = #tpu.pipeline_mode<synchronous>, transform_indices = @transform_14, window_bounds = array<i64: 128, 128>}, {pipeline_mode = #tpu.pipeline_mode<synchronous>, transform_indices = @transform_15, window_bounds = array<i64: 1, 128>}, {pipeline_mode = #tpu.pipeline_mode<synchronous>, transform_indices = @transform_16, window_bounds = array<i64: 128, 128>}, {pipeline_mode = #tpu.pipeline_mode<synchronous>, transform_indices = @transform_17, window_bounds = array<i64: 1, 128>}, {pipeline_mode = #tpu.pipeline_mode<synchronous>, transform_indices = @transform_18, window_bounds = array<i64: 8, 128>}, {transform_indices = @transform_19, window_bounds = array<i64: 8, 128>}]} {
    %c0_i32 = arith.constant 0 : i32
    %0 = arith.cmpi eq, %arg0, %c0_i32 : i32
    %1 = arith.extui %0 : i1 to i32
    %c0_i32_0 = arith.constant 0 : i32
    %2 = arith.cmpi ne, %1, %c0_i32_0 : i32
    scf.if %2 {
      %cst_39 = arith.constant 0.000000e+00 : f32
      %52 = vector.broadcast %cst_39 : f32 to vector<8x128xf32>
      %c0_40 = arith.constant 0 : index
      %c0_41 = arith.constant 0 : index
      %53 = vector.load %arg21[%c0_40, %c0_41] : memref<8x128xf32, #tpu.memory_space<vmem>>, vector<8x128xf32>
      tpu.vector_store %arg21[%c0_40, %c0_41], %52 {strides = array<i32>} : memref<8x128xf32, #tpu.memory_space<vmem>>, vector<8x128xf32>,
    } else {
    }
    %c0 = arith.constant 0 : index
    %c0_1 = arith.constant 0 : index
    %3 = vector.load %arg1[%c0, %c0_1] : memref<8x8xf32, #tpu.memory_space<vmem>>, vector<8x8xf32>
    %c0_2 = arith.constant 0 : index
    %c0_3 = arith.constant 0 : index
    %4 = vector.load %arg5[%c0_2, %c0_3] : memref<8x4xf32, #tpu.memory_space<vmem>>, vector<8x4xf32>
    %c0_4 = arith.constant 0 : index
    %c0_5 = arith.constant 0 : index
    %5 = vector.load %arg3[%c0_4, %c0_5] : memref<8x1xi32, #tpu.memory_space<vmem>>, vector<8x1xi32>
    %c0_6 = arith.constant 0 : index
    %c0_7 = arith.constant 0 : index
    %6 = vector.load %arg4[%c0_6, %c0_7] : memref<8x1xi32, #tpu.memory_space<vmem>>, vector<8x1xi32>
    %7 = tpu.concatenate %5, %6 in 0 : vector<8x1xi32>, vector<8x1xi32> -> vector<16x1xi32>
    %8 = tpu.iota {dimensions = array<i32: 1>} : vector<16x8xi32>
    %9 = vector.broadcast %7 : vector<16x1xi32> to vector<16x8xi32>
    %10 = arith.cmpi eq, %8, %9 : vector<16x8xi32>
    %11 = arith.extui %10 : vector<16x8xi1> to vector<16x8xi32>
    %12 = arith.sitofp %11 : vector<16x8xi32> to vector<16x8xf32>
    %cst = arith.constant dense<0.000000e+00> : vector<16x8xf32>
    %13 = tpu.matmul %12, %3, %cst {dimension_numbers = #tpu.dot_dimension_numbers<[1], [0], [0], [1], [0, 0, 1, 1], [], []>} : vector<16x8xf32>, vector<8x8xf32>, vector<16x8xf32> -> vector<16x8xf32>
    %14 = vector.extract_strided_slice %13 {offsets = [0, 0], sizes = [8, 8], strides = [1, 1]} : vector<16x8xf32> to vector<8x8xf32>
    %15 = vector.extract_strided_slice %13 {offsets = [8, 0], sizes = [8, 8], strides = [1, 1]} : vector<16x8xf32> to vector<8x8xf32>
    %c0_8 = arith.constant 0 : index
    %c0_9 = arith.constant 0 : index
    %16 = vector.load %arg6[%c0_8, %c0_9] : memref<8x256xf32, #tpu.memory_space<vmem>>, vector<8x256xf32>
    %cst_10 = arith.constant dense<0.000000e+00> : vector<8x256xf32>
    %17 = tpu.matmul %14, %16, %cst_10 {dimension_numbers = #tpu.dot_dimension_numbers<[1], [0], [0], [1], [0, 0, 1, 1], [], []>} : vector<8x8xf32>, vector<8x256xf32>, vector<8x256xf32> -> vector<8x256xf32>
    %c0_11 = arith.constant 0 : index
    %c0_12 = arith.constant 0 : index
    %18 = vector.load %arg8[%c0_11, %c0_12] : memref<4x256xf32, #tpu.memory_space<vmem>>, vector<4x256xf32>
    %cst_13 = arith.constant dense<0.000000e+00> : vector<8x256xf32>
    %19 = tpu.matmul %4, %18, %cst_13 {dimension_numbers = #tpu.dot_dimension_numbers<[1], [0], [0], [1], [0, 0, 1, 1], [], []>} : vector<8x4xf32>, vector<4x256xf32>, vector<8x256xf32> -> vector<8x256xf32>
    %20 = arith.addf %17, %19 : vector<8x256xf32>
    %c0_14 = arith.constant 0 : index
    %c0_15 = arith.constant 0 : index
    %21 = vector.load %arg9[%c0_14, %c0_15] : memref<1x256xf32, #tpu.memory_space<vmem>>, vector<1x256xf32>
    %22 = vector.broadcast %21 : vector<1x256xf32> to vector<8x256xf32>
    %23 = arith.addf %20, %22 : vector<8x256xf32>
    %24 = vector.extract_strided_slice %23 {offsets = [0, 0], sizes = [8, 128], strides = [1, 1]} : vector<8x256xf32> to vector<8x128xf32>
    %c0_16 = arith.constant 0 : index
    %c0_17 = arith.constant 0 : index
    %25 = vector.load %arg7[%c0_16, %c0_17] : memref<8x128xf32, #tpu.memory_space<vmem>>, vector<8x128xf32>
    %cst_18 = arith.constant dense<0.000000e+00> : vector<8x128xf32>
    %26 = tpu.matmul %15, %25, %cst_18 {dimension_numbers = #tpu.dot_dimension_numbers<[1], [0], [0], [1], [0, 0, 1, 1], [], []>} : vector<8x8xf32>, vector<8x128xf32>, vector<8x128xf32> -> vector<8x128xf32>
    %27 = arith.addf %24, %26 : vector<8x128xf32>
    %cst_19 = arith.constant 0.000000e+00 : f32
    %28 = vector.broadcast %cst_19 : f32 to vector<8x128xf32>
    %29 = arith.maximumf %27, %28 : vector<8x128xf32>
    %30 = vector.extract_strided_slice %23 {offsets = [0, 128], sizes = [8, 128], strides = [1, 1]} : vector<8x256xf32> to vector<8x128xf32>
    %cst_20 = arith.constant 0.000000e+00 : f32
    %31 = vector.broadcast %cst_20 : f32 to vector<8x128xf32>
    %32 = arith.maximumf %30, %31 : vector<8x128xf32>
    %c0_21 = arith.constant 0 : index
    %c0_22 = arith.constant 0 : index
    %33 = vector.load %arg10[%c0_21, %c0_22] : memref<128x128xf32, #tpu.memory_space<vmem>>, vector<128x128xf32>
    %cst_23 = arith.constant dense<0.000000e+00> : vector<8x128xf32>
    %34 = tpu.matmul %29, %33, %cst_23 {dimension_numbers = #tpu.dot_dimension_numbers<[1], [0], [0], [1], [0, 0, 1, 1], [], []>} : vector<8x128xf32>, vector<128x128xf32>, vector<8x128xf32> -> vector<8x128xf32>
    %c0_24 = arith.constant 0 : index
    %c0_25 = arith.constant 0 : index
    %35 = vector.load %arg11[%c0_24, %c0_25] : memref<1x128xf32, #tpu.memory_space<vmem>>, vector<1x128xf32>
    %36 = vector.broadcast %35 : vector<1x128xf32> to vector<8x128xf32>
    %37 = arith.addf %34, %36 : vector<8x128xf32>
    %c0_26 = arith.constant 0 : index
    %c0_27 = arith.constant 0 : index
    %38 = vector.load %arg20[%c0_26, %c0_27] : memref<8x128xf32, #tpu.memory_space<vmem>>, vector<8x128xf32>
    tpu.vector_store %arg20[%c0_26, %c0_27], %37 {strides = array<i32>} : memref<8x128xf32, #tpu.memory_space<vmem>>, vector<8x128xf32>,
    %c0_28 = arith.constant 0 : index
    %c0_29 = arith.constant 0 : index
    %39 = vector.load %arg12[%c0_28, %c0_29] : memref<128x128xf32, #tpu.memory_space<vmem>>, vector<128x128xf32>
    %cst_30 = arith.constant dense<0.000000e+00> : vector<8x128xf32>
    %40 = tpu.matmul %32, %39, %cst_30 {dimension_numbers = #tpu.dot_dimension_numbers<[1], [0], [0], [1], [0, 0, 1, 1], [], []>} : vector<8x128xf32>, vector<128x128xf32>, vector<8x128xf32> -> vector<8x128xf32>
    %c0_31 = arith.constant 0 : index
    %c0_32 = arith.constant 0 : index
    %41 = vector.load %arg13[%c0_31, %c0_32] : memref<1x128xf32, #tpu.memory_space<vmem>>, vector<1x128xf32>
    %42 = vector.broadcast %41 : vector<1x128xf32> to vector<8x128xf32>
    %43 = arith.addf %40, %42 : vector<8x128xf32>
    %44 = vector.extract_strided_slice %12 {offsets = [8, 0], sizes = [8, 8], strides = [1, 1]} : vector<16x8xf32> to vector<8x8xf32>
    %c0_33 = arith.constant 0 : index
    %c0_34 = arith.constant 0 : index
    %45 = vector.load %arg21[%c0_33, %c0_34] : memref<8x128xf32, #tpu.memory_space<vmem>>, vector<8x128xf32>
    %cst_35 = arith.constant dense<0.000000e+00> : vector<8x128xf32>
    %46 = tpu.matmul %44, %43, %cst_35 {dimension_numbers = #tpu.dot_dimension_numbers<[0], [0], [1], [1], [0, 1, 1, 1], [], []>} : vector<8x8xf32>, vector<8x128xf32>, vector<8x128xf32> -> vector<8x128xf32>
    %47 = arith.addf %45, %46 : vector<8x128xf32>
    %c0_36 = arith.constant 0 : index
    %c0_37 = arith.constant 0 : index
    %48 = vector.load %arg21[%c0_36, %c0_37] : memref<8x128xf32, #tpu.memory_space<vmem>>, vector<8x128xf32>
    tpu.vector_store %arg21[%c0_36, %c0_37], %47 {strides = array<i32>} : memref<8x128xf32, #tpu.memory_space<vmem>>, vector<8x128xf32>,
    %c2_i32 = arith.constant 2 : i32
    %49 = arith.cmpi eq, %arg0, %c2_i32 : i32
    %50 = arith.extui %49 : i1 to i32
    %c0_i32_38 = arith.constant 0 : i32
    %51 = arith.cmpi ne, %50, %c0_i32_38 : i32
    scf.if %51 {
      %c0_39 = arith.constant 0 : index
      %c0_40 = arith.constant 0 : index
      %52 = vector.load %arg21[%c0_39, %c0_40] : memref<8x128xf32, #tpu.memory_space<vmem>>, vector<8x128xf32>
      %c0_41 = arith.constant 0 : index
      %c0_42 = arith.constant 0 : index
      %53 = vector.load %arg2[%c0_41, %c0_42] : memref<8x1xf32, #tpu.memory_space<vmem>>, vector<8x1xf32>
      %54 = vector.broadcast %53 : vector<8x1xf32> to vector<8x128xf32>
      %55 = arith.divf %52, %54 : vector<8x128xf32>
      %c0_43 = arith.constant 0 : index
      %c0_44 = arith.constant 0 : index
      %56 = vector.load %arg14[%c0_43, %c0_44] : memref<8x128xf32, #tpu.memory_space<vmem>>, vector<8x128xf32>
      %cst_45 = arith.constant dense<0.000000e+00> : vector<8x128xf32>
      %57 = tpu.matmul %3, %56, %cst_45 {dimension_numbers = #tpu.dot_dimension_numbers<[1], [0], [0], [1], [0, 0, 1, 1], [], []>} : vector<8x8xf32>, vector<8x128xf32>, vector<8x128xf32> -> vector<8x128xf32>
      %c0_46 = arith.constant 0 : index
      %c0_47 = arith.constant 0 : index
      %58 = vector.load %arg15[%c0_46, %c0_47] : memref<128x128xf32, #tpu.memory_space<vmem>>, vector<128x128xf32>
      %cst_48 = arith.constant dense<0.000000e+00> : vector<8x128xf32>
      %59 = tpu.matmul %55, %58, %cst_48 {dimension_numbers = #tpu.dot_dimension_numbers<[1], [0], [0], [1], [0, 0, 1, 1], [], []>} : vector<8x128xf32>, vector<128x128xf32>, vector<8x128xf32> -> vector<8x128xf32>
      %60 = arith.addf %57, %59 : vector<8x128xf32>
      %c0_49 = arith.constant 0 : index
      %c0_50 = arith.constant 0 : index
      %61 = vector.load %arg16[%c0_49, %c0_50] : memref<1x128xf32, #tpu.memory_space<vmem>>, vector<1x128xf32>
      %62 = vector.broadcast %61 : vector<1x128xf32> to vector<8x128xf32>
      %63 = arith.addf %60, %62 : vector<8x128xf32>
      %cst_51 = arith.constant 0.000000e+00 : f32
      %64 = vector.broadcast %cst_51 : f32 to vector<8x128xf32>
      %65 = arith.maximumf %63, %64 : vector<8x128xf32>
      %c0_52 = arith.constant 0 : index
      %c0_53 = arith.constant 0 : index
      %66 = vector.load %arg17[%c0_52, %c0_53] : memref<128x128xf32, #tpu.memory_space<vmem>>, vector<128x128xf32>
      %cst_54 = arith.constant dense<0.000000e+00> : vector<8x128xf32>
      %67 = tpu.matmul %65, %66, %cst_54 {dimension_numbers = #tpu.dot_dimension_numbers<[1], [0], [0], [1], [0, 0, 1, 1], [], []>} : vector<8x128xf32>, vector<128x128xf32>, vector<8x128xf32> -> vector<8x128xf32>
      %c0_55 = arith.constant 0 : index
      %c0_56 = arith.constant 0 : index
      %68 = vector.load %arg18[%c0_55, %c0_56] : memref<1x128xf32, #tpu.memory_space<vmem>>, vector<1x128xf32>
      %69 = vector.broadcast %68 : vector<1x128xf32> to vector<8x128xf32>
      %70 = arith.addf %67, %69 : vector<8x128xf32>
      %c0_57 = arith.constant 0 : index
      %c0_58 = arith.constant 0 : index
      %71 = vector.load %arg19[%c0_57, %c0_58] : memref<8x128xf32, #tpu.memory_space<vmem>>, vector<8x128xf32>
      tpu.vector_store %arg19[%c0_57, %c0_58], %70 {strides = array<i32>} : memref<8x128xf32, #tpu.memory_space<vmem>>, vector<8x128xf32>,
    } else {
    }
    return
  }
  func.func @transform_0(%arg0: i32) -> (i32, i32) {
    %c0_i32 = arith.constant 0 : i32
    %c0_i32_0 = arith.constant 0 : i32
    %c0_i32_1 = arith.constant 0 : i32
    return %c0_i32, %c0_i32_0 : i32, i32
  }
  func.func @transform_1(%arg0: i32) -> (i32, i32) {
    %c0_i32 = arith.constant 0 : i32
    %c0_i32_0 = arith.constant 0 : i32
    %c0_i32_1 = arith.constant 0 : i32
    return %c0_i32, %c0_i32_0 : i32, i32
  }
  func.func @transform_2(%arg0: i32) -> (i32, i32) {
    %c0_i32 = arith.constant 0 : i32
    %c0_i32_0 = arith.constant 0 : i32
    return %arg0, %c0_i32 : i32, i32
  }
  func.func @transform_3(%arg0: i32) -> (i32, i32) {
    %c0_i32 = arith.constant 0 : i32
    %c0_i32_0 = arith.constant 0 : i32
    return %arg0, %c0_i32 : i32, i32
  }
  func.func @transform_4(%arg0: i32) -> (i32, i32) {
    %c0_i32 = arith.constant 0 : i32
    %c0_i32_0 = arith.constant 0 : i32
    return %arg0, %c0_i32 : i32, i32
  }
  func.func @transform_5(%arg0: i32) -> (i32, i32) {
    %c0_i32 = arith.constant 0 : i32
    %c0_i32_0 = arith.constant 0 : i32
    %c0_i32_1 = arith.constant 0 : i32
    return %c0_i32, %c0_i32_0 : i32, i32
  }
  func.func @transform_6(%arg0: i32) -> (i32, i32) {
    %c0_i32 = arith.constant 0 : i32
    %c0_i32_0 = arith.constant 0 : i32
    %c0_i32_1 = arith.constant 0 : i32
    return %c0_i32, %c0_i32_0 : i32, i32
  }
  func.func @transform_7(%arg0: i32) -> (i32, i32) {
    %c0_i32 = arith.constant 0 : i32
    %c0_i32_0 = arith.constant 0 : i32
    %c0_i32_1 = arith.constant 0 : i32
    return %c0_i32, %c0_i32_0 : i32, i32
  }
  func.func @transform_8(%arg0: i32) -> (i32, i32) {
    %c0_i32 = arith.constant 0 : i32
    %c0_i32_0 = arith.constant 0 : i32
    %c0_i32_1 = arith.constant 0 : i32
    return %c0_i32, %c0_i32_0 : i32, i32
  }
  func.func @transform_9(%arg0: i32) -> (i32, i32) {
    %c0_i32 = arith.constant 0 : i32
    %c0_i32_0 = arith.constant 0 : i32
    %c0_i32_1 = arith.constant 0 : i32
    return %c0_i32, %c0_i32_0 : i32, i32
  }
  func.func @transform_10(%arg0: i32) -> (i32, i32) {
    %c0_i32 = arith.constant 0 : i32
    %c0_i32_0 = arith.constant 0 : i32
    %c0_i32_1 = arith.constant 0 : i32
    return %c0_i32, %c0_i32_0 : i32, i32
  }
  func.func @transform_11(%arg0: i32) -> (i32, i32) {
    %c0_i32 = arith.constant 0 : i32
    %c0_i32_0 = arith.constant 0 : i32
    %c0_i32_1 = arith.constant 0 : i32
    return %c0_i32, %c0_i32_0 : i32, i32
  }
  func.func @transform_12(%arg0: i32) -> (i32, i32) {
    %c0_i32 = arith.constant 0 : i32
    %c0_i32_0 = arith.constant 0 : i32
    %c0_i32_1 = arith.constant 0 : i32
    return %c0_i32, %c0_i32_0 : i32, i32
  }
  func.func @transform_13(%arg0: i32) -> (i32, i32) {
    %c0_i32 = arith.constant 0 : i32
    %c0_i32_0 = arith.constant 0 : i32
    %c0_i32_1 = arith.constant 0 : i32
    return %c0_i32, %c0_i32_0 : i32, i32
  }
  func.func @transform_14(%arg0: i32) -> (i32, i32) {
    %c0_i32 = arith.constant 0 : i32
    %c0_i32_0 = arith.constant 0 : i32
    %c0_i32_1 = arith.constant 0 : i32
    return %c0_i32, %c0_i32_0 : i32, i32
  }
  func.func @transform_15(%arg0: i32) -> (i32, i32) {
    %c0_i32 = arith.constant 0 : i32
    %c0_i32_0 = arith.constant 0 : i32
    %c0_i32_1 = arith.constant 0 : i32
    return %c0_i32, %c0_i32_0 : i32, i32
  }
  func.func @transform_16(%arg0: i32) -> (i32, i32) {
    %c0_i32 = arith.constant 0 : i32
    %c0_i32_0 = arith.constant 0 : i32
    %c0_i32_1 = arith.constant 0 : i32
    return %c0_i32, %c0_i32_0 : i32, i32
  }
  func.func @transform_17(%arg0: i32) -> (i32, i32) {
    %c0_i32 = arith.constant 0 : i32
    %c0_i32_0 = arith.constant 0 : i32
    %c0_i32_1 = arith.constant 0 : i32
    return %c0_i32, %c0_i32_0 : i32, i32
  }
  func.func @transform_18(%arg0: i32) -> (i32, i32) {
    %c0_i32 = arith.constant 0 : i32
    %c0_i32_0 = arith.constant 0 : i32
    %c0_i32_1 = arith.constant 0 : i32
    return %c0_i32, %c0_i32_0 : i32, i32
  }
  func.func @transform_19(%arg0: i32) -> (i32, i32) {
    %c0_i32 = arith.constant 0 : i32
    %c0_i32_0 = arith.constant 0 : i32
    return %arg0, %c0_i32 : i32, i32
  }
}

</mosaic_0001>

<bundles_post_ra>
// kernel: edge_node_model.1
= control target key start
LH: loop header
LB: loop body
LE: loop exit
PB: predicated region body
PF: predicated region fallthrough
CT: control target
= control target key end

     0   :  { %s2550_s0 = inlined_call_operand.vmem [shape: f32[8,8], index: 0, kind: input, shape index: {}]   ;;  %s2551_s1 = inlined_call_operand.vmem [shape: f32[8,1], index: 1, kind: input, shape index: {}]   ;;  %s2552_s2 = inlined_call_operand.vmem [shape: s32[24,1], index: 2, kind: input, shape index: {}]   ;;  %s2553_s3 = inlined_call_operand.vmem [shape: s32[24,1], index: 3, kind: input, shape index: {}]   ;;  %s2554_s4 = inlined_call_operand.vmem [shape: f32[24,4], index: 4, kind: input, shape index: {}]   ;;  %s2555_s5 = inlined_call_operand.vmem [shape: f32[8,256], index: 5, kind: input, shape index: {}]   ;;  %s2556_s6 = inlined_call_operand.vmem [shape: f32[8,128], index: 6, kind: input, shape index: {}]   ;;  %s2557_s7 = inlined_call_operand.vmem [shape: f32[4,256], index: 7, kind: input, shape index: {}]   ;;  %s2558_s8 = inlined_call_operand.vmem [shape: f32[1,256], index: 8, kind: input, shape index: {}]   ;;  %s2559_s9 = inlined_call_operand.vmem [shape: f32[128,128], index: 9, kind: input, shape index: {}]   ;;  %s2560_s10 = inlined_call_operand.vmem [shape: f32[1,128], index: 10, kind: input, shape index: {}]   ;;  %s2561_s11 = inlined_call_operand.vmem [shape: f32[128,128], index: 11, kind: input, shape index: {}]   ;;  %s2562_s12 = inlined_call_operand.vmem [shape: f32[1,128], index: 12, kind: input, shape index: {}]   ;;  %s2563_s13 = inlined_call_operand.vmem [shape: f32[8,128], index: 13, kind: input, shape index: {}]   ;;  %s2564_s14 = inlined_call_operand.vmem [shape: f32[128,128], index: 14, kind: input, shape index: {}]   ;;  %s2565_s15 = inlined_call_operand.vmem [shape: f32[1,128], index: 15, kind: input, shape index: {}]   ;;  %s2566_s16 = inlined_call_operand.vmem [shape: f32[128,128], index: 16, kind: input, shape index: {}]   ;;  %s2567_s17 = inlined_call_operand.vmem [shape: f32[1,128], index: 17, kind: input, shape index: {}]   ;;  %s2568_s18 = inlined_call_operand.hbm [shape: f32[8,128], index: 18, kind: output, shape index: {0}]   ;;  %s2569_s19 = inlined_call_operand.vmem [shape: f32[24,128], index: 19, kind: output, shape index: {1}]  }
   0x1   :  { %2572 = sst [smem:[#allocation7_spill]] %s2550_s0 }
   0x2   :  { %2573 = sst [smem:[#allocation8_spill]] %s2551_s1 }
   0x3   :  { %2574 = sst [smem:[#allocation9_spill]] %s2552_s2 }
   0x4   :  { %2575 = sst [smem:[#allocation10_spill]] %s2553_s3 }
   0x5   :  { %2576 = sst [smem:[#allocation11_spill]] %s2568_s18 }
   0x6   :  { %25 = vsyncpa [#allocation4], 0  ;;  %s2200_s0 = smov 0  }
   0x7 LB: > { %2577 = sst [smem:[#allocation6_spill]] %s2088_s0  ;;  %s2206_s30 = sadd.s32 4294967295, %s2088_s0   ;;  %s2088_s0 = sphi %s2200_s0, %s31_s0  }
   0x8   : > { %p1662_p0 = scmp.ge.s32.totalorder %s2088_s0, 1  ;;  %p553_p1 = scmp.lt.s32.totalorder %s2088_s0, 4 }
   0xa   : > { %p554_p2 = pnand %p1662_p0, %p553_p1 }
   0xb   : > { %p615_p3 = scmp.lt.s32.totalorder (!%p554_p2), %s2206_s30, 2  ;;  %s2578_s2 = sld [smem:[#allocation9_spill]] (!%p554_p2) }
   0xc   : > { %557 = sbr.rel (%p554_p2) target bundleno = 1496 (0x5d8), region = 92  ;;  %s2579_s3 = sld [smem:[#allocation10_spill]] (!%p554_p2) }
   0xd   : > { %p1667_p4 = scmp.ne.s32.totalorder (!%p554_p2), %s2206_s30, 0 }
  0x13   : > { %s616_s20 = scalar_select %p615_p3, %s2206_s30, 2 }
  0x14   : > { %634 = sbr.rel (%p1667_p4) target bundleno = 27 (0x1b), region = 96  ;;  %v2090_v0 = vmov (!%p1667_p4), 0.0  }
  0x15   : > { %s2212_s21 = sshll.u32 %s616_s20, 3  ;;  %635 = vst [vmem:[#allocation2] sm:$0xff] (!%p1667_p4), %v2090_v0 }
  0x16   : > { %s618_s23 = scalar_lea.vmem %s2578_s2, %s2212_s21  ;;  %s622_s26 = scalar_lea.vmem %s2579_s3, %s2212_s21 }
  0x17   : > { %s626_s29 = scalar_lea.vmem %s2554_s4, %s2212_s21  ;;  %s630_s20 = scalar_lea.vmem %s2569_s19, %s2212_s21 }
  0x1b PF: > { %v638_v1 = vld [vmem:[%s618_s23] sm:$0xff]  ;;  %v2091_v2 = vmov 0   ;;  %v2092_v4 = vmov 0.0   ;;  %s2580_s2 = sld [smem:[#allocation7_spill]]  ;;  %vm745_vm0 = vcmask 1043456   ;;  %vm741_vm1 = vcmask 31744  }
  0x1c   : > { %2047 = vset.pattern.permute.xlu0 %v2091_v2  ;;  %v639_v3 = vld [vmem:[%s622_s26] sm:$0xff]  ;;  %814 = vmatprep.mubr.f32.mxu1 %v2092_v4  ;;  %v737_v9 = vld [vmem:[%s2555_s5 + $0x8] sm:$0xff]  ;;  %v640_v11 = vlaneseq  ;;  %vm654_vm2 = vcmask 64512   ;;  %vm2093_vm5 = vmmov 0   ;;  %v2094_v18 = vmov 0.0|0.0   ;;  %v988_v25 = vld [vmem:[%s2559_s9 + $0x10] sm:$0xff] }
  0x1d   : > { %643 = vperm.xlu0 %2047, %v638_v1   ;;  %v738_v6 = vld [vmem:[%s2557_s7] sm:$0xff]  ;;  %v987_v20 = vld [vmem:[%s2559_s9 + $0x8] sm:$0xff]  ;;  %v989_v26 = vld [vmem:[%s2559_s9 + $0x18] sm:$0xff]  ;;  %p1680_p5 = scmp.ne.s32.totalorder %s2206_s30, 2 }
  0x1e   : > { %v740_v7 = vcombine.high %v738_v6, %v738_v6  ;;  %v637_v8 = vld [vmem:[%s626_s29] sm:$0xff]  ;;  %v641_v12 = vand.u32 127, %v640_v11  ;;  %v1081_v22 = vld [vmem:[%s2561_s11 + $0x8] sm:$0xff]  ;;  %v1082_v28 = vld [vmem:[%s2561_s11 + $0x10] sm:$0xff]  ;;  %v1929_v31 = vpack.c.bf16 %v989_v26, %v988_v25  ;;  %s2581_s25 = sld [smem:[#allocation8_spill]] (!%p1680_p5)  ;;  %vm2098_vm6 = vmmov (!%p1680_p5), 0  }
  0x1f   : > { %v736_v10 = vld [vmem:[%s2555_s5] sm:$0xff]  ;;  %v1083_v29 = vld [vmem:[%s2561_s11 + $0x18] sm:$0xff]  ;;  %v991_v34 = vld [vmem:[%s2559_s9 + $0x28] sm:$0xff] }
  0x20   : > { %1672 = vmatprep.subr.msk.mxu1 %vm745_vm0, %v740_v7  ;;  %v909_v17 = vld [vmem:[%s2556_s6] sm:$0xff]  ;;  %v1953_v32 = vpack.c.bf16 %v1083_v29, %v1082_v28  ;;  %v1085_v36 = vld [vmem:[%s2561_s11 + $0x28] sm:$0xff]  ;;  %v992_v39 = vld [vmem:[%s2559_s9 + $0x30] sm:$0xff]  ;;  %v898_v7 = vshrl.u32 %v640_v11, 7 }
  0x21   : > { %v2235_v5 = vld [vmem:[%s2580_s2] sm:$0xff]  ;;  %646 = vperm.xlu0 %2047, %v639_v3   ;;  %1673 = vmatpush1.msk.msra.mxu1 %vm745_vm0, %v738_v6  ;;  %v993_v40 = vld [vmem:[%s2559_s9 + $0x38] sm:$0xff]  ;;  %v1086_v41 = vld [vmem:[%s2561_s11 + $0x30] sm:$0xff] }
  0x22   : > { %1765 = vmatprep.subr.mxu0 %v2235_v5  ;;  %1674 = vmatmul.mubr.msk.f32.vlgmr.msra.gmra.mrb[0].mxu1 %vm741_vm1, %v637_v8  ;;  %v986_v19 = vld [vmem:[%s2559_s9] sm:$0xff]  ;;  %v1087_v42 = vld [vmem:[%s2561_s11 + $0x38] sm:$0xff]  ;;  %v1935_v43 = vpack.c.bf16 %v993_v40, %v992_v39  ;;  %v995_v46 = vld [vmem:[%s2559_s9 + $0x48] sm:$0xff]  ;;  %v899_v8 = vsub.s32 0, %v898_v7 }
  0x23   : > { %1766 = vmatpush3.msra.mxu0 %v2235_v5  ;;  %824 = vmatprep.subr.mxu1 %v737_v9  ;;  %v1080_v21 = vld [vmem:[%s2561_s11] sm:$0xff]  ;;  %v1926_v23 = vpack.c.bf16 %v987_v20, %v986_v19  ;;  %v1959_v44 = vpack.c.bf16 %v1087_v42, %v1086_v41  ;;  %v1089_v48 = vld [vmem:[%s2561_s11 + $0x48] sm:$0xff]  ;;  %v996_v51 = vld [vmem:[%s2559_s9 + $0x50] sm:$0xff] }
  0x24   : > { %1770 = vmatprep.subr.mxu0 %v2092_v4  ;;  %825 = vmatpush1.msra.mxu1 %v736_v10  ;;  %v1950_v24 = vpack.c.bf16 %v1081_v22, %v1080_v21  ;;  %v990_v33 = vld [vmem:[%s2559_s9 + $0x20] sm:$0xff]  ;;  %v997_v52 = vld [vmem:[%s2559_s9 + $0x58] sm:$0xff]  ;;  %v1090_v53 = vld [vmem:[%s2561_s11 + $0x50] sm:$0xff]  ;;  %v903_v10 = vsub.s32 1, %v898_v7 }
  0x25   : > { %888 = vmatprep.mubr.f32.mxu1 %v2092_v4  ;;  %1949 = vmatprep.subr.bf16.mxu1 %v2094_v18  ;;  %v1084_v35 = vld [vmem:[%s2561_s11 + $0x20] sm:$0xff]  ;;  %v1932_v37 = vpack.c.bf16 %v991_v34, %v990_v33  ;;  %v1091_v54 = vld [vmem:[%s2561_s11 + $0x58] sm:$0xff]  ;;  %v1941_v55 = vpack.c.bf16 %v997_v52, %v996_v51  ;;  %v1093_v58 = vld [vmem:[%s2561_s11 + $0x68] sm:$0xff] }
  0x26   : > { %v1956_v38 = vpack.c.bf16 %v1085_v36, %v1084_v35  ;;  %v994_v45 = vld [vmem:[%s2559_s9 + $0x40] sm:$0xff]  ;;  %v1965_v56 = vpack.c.bf16 %v1091_v54, %v1090_v53  ;;  %v999_v61 = vld [vmem:[%s2559_s9 + $0x68] sm:$0xff]  ;;  %v1094_v63 = vld [vmem:[%s2561_s11 + $0x70] sm:$0xff] }
  0x27   : > { %v1088_v47 = vld [vmem:[%s2561_s11 + $0x40] sm:$0xff]  ;;  %v1938_v49 = vpack.c.bf16 %v995_v46, %v994_v45  ;;  %v1095_v0 = vld [vmem:[%s2561_s11 + $0x78] sm:$0xff]  ;;  %v1000_v2 = vld [vmem:[%s2559_s9 + $0x70] sm:$0xff] }
  0x28   : > { %v1962_v50 = vpack.c.bf16 %v1089_v48, %v1088_v47  ;;  %v1092_v57 = vld [vmem:[%s2561_s11 + $0x60] sm:$0xff]  ;;  %v1971_v1 = vpack.c.bf16 %v1095_v0, %v1094_v63  ;;  %v1001_v3 = vld [vmem:[%s2559_s9 + $0x78] sm:$0xff]  ;;  %v1296_v36 = vld [vmem:[%s2564_s14 + $0x8] sm:$0xff] (!%p1680_p5) }
  0x29   : > { %v1968_v59 = vpack.c.bf16 %v1093_v58, %v1092_v57  ;;  %v998_v60 = vld [vmem:[%s2559_s9 + $0x60] sm:$0xff]  ;;  %v1947_v6 = vpack.c.bf16 %v1001_v3, %v1000_v2  ;;  %v1297_v40 = vld [vmem:[%s2564_s14 + $0x10] sm:$0xff] (!%p1680_p5)  ;;  %v1298_v41 = vld [vmem:[%s2564_s14 + $0x18] sm:$0xff] (!%p1680_p5) }
  0x2a   : > { %v1944_v62 = vpack.c.bf16 %v999_v61, %v998_v60  ;;  %v895_v9 = vld [vmem:[%s2558_s8] sm:$0x3]  ;;  %v1977_v42 = vpack.c.bf16 (!%p1680_p5), %v1298_v41, %v1297_v40  ;;  %v1300_v45 = vld [vmem:[%s2564_s14 + $0x28] sm:$0xff] (!%p1680_p5)  ;;  %v1301_v48 = vld [vmem:[%s2564_s14 + $0x30] sm:$0xff] (!%p1680_p5) }
  0x2b   : > { %v1678_v11 = vld [vmem:[%s2562_s12] ss:$0 sm:$0xff]  ;;  %v1304_v51 = vld [vmem:[%s2564_s14 + $0x48] sm:$0xff] (!%p1680_p5)  ;;  %v1306_v57 = vld [vmem:[%s2564_s14 + $0x58] sm:$0xff] (!%p1680_p5) }
  0x2c   : > { %v1286_v34 = vld [vmem:[%s2581_s25] sm:$0xff] (!%p1680_p5)  ;;  %v1464_v54 = vld [vmem:[%s2566_s16 + $0x8] sm:$0xff] (!%p1680_p5)  ;;  %v1470_v7 = vld [vmem:[%s2566_s16 + $0x38] sm:$0xff] (!%p1680_p5) }
  0x2d   : > { %v1295_v35 = vld [vmem:[%s2564_s14] sm:$0xff] (!%p1680_p5)  ;;  %v1468_v63 = vld [vmem:[%s2566_s16 + $0x28] sm:$0xff] (!%p1680_p5) }
  0x2e   : > { %v1974_v39 = vpack.c.bf16 (!%p1680_p5), %v1296_v36, %v1295_v35  ;;  %v1294_v46 = vld [vmem:[%s2563_s13] sm:$0xff] (!%p1680_p5) }
  0x2f   : > { %v1463_v53 = vld [vmem:[%s2566_s16] sm:$0xff] (!%p1680_p5) }
  0x30   : > { %v1998_v58 = vpack.c.bf16 (!%p1680_p5), %v1464_v54, %v1463_v53  ;;  %v1307_v0 = vld [vmem:[%s2564_s14 + $0x60] sm:$0xff] (!%p1680_p5) }
  0x31   : > { %v1683_v35 = vld [vmem:[%s2567_s17] ss:$0 sm:$0xff] (!%p1680_p5) }
  0x9c   : > { %v644_v13 = vpop.permute.xlu0 %643 }
  0x9d   : > { %vm648_vm3 = vcmp.eq.s32.totalorder %v641_v12, %v644_v13  ;;  %v904_v13 = vrot.slane %v895_v9, %v903_v10 }
  0x9e   : > { %v1668_v14 = vsel %vm648_vm3, 1.0, %v2092_v4 }
  0x9f   : > { %1767 = vmatprep.mubr.msk.f32.mxu0 %vm654_vm2, %v1668_v14 }
  0xa0   : > { %v647_v15 = vpop.permute.xlu0 %646 }
  0xa1   : > { %vm649_vm4 = vcmp.eq.s32.totalorder %v641_v12, %v647_v15  ;;  %v900_v12 = vrot.slane %v895_v9, %v899_v8  ;;  %v1309_v8 = vld [vmem:[%s2564_s14 + $0x70] sm:$0xff] (!%p1680_p5)  ;;  %v1310_v9 = vld [vmem:[%s2564_s14 + $0x78] sm:$0xff] (!%p1680_p5) }
  0xa2   : > { %v1669_v16 = vsel %vm649_vm4, 1.0, %v2092_v4 }
  0xa3   : > { %1174 = vxpose.xlu1.b32.start.end [1/1] (short) (narrow) %v1669_v16, 8  ;;  %1768 = vmatmul.mubr.msk.f32.vlgmr.msra.gmra.mrb[0].mxu0 %vm654_vm2, %v1669_v16 }
  0xa4   : > { %1771 = vmatpush3.msra.mxu0 %v909_v17  ;;  %1772 = vmatprep.mubr.msk.f32.mxu0 %vm2093_vm5, %v2092_v4 }
  0xa5   : > { %1925 = vmatprep.subr.bf16.mxu0 %v2094_v18 }
 0x123   : > { %v1190_v25 = vpop.trf.xlu1 }
 0x176   : > { %v1769_v27 = vpop.f32.mrb[0].mxu0 }
 0x177   : > { %v727_v30 = vpop.f32.mrb[1].mxu0  ;;  %1773 = vmatmul.mubr.msk.f32.vlgmr.msra.gmra.mrb[2].mxu0 %vm654_vm2, %v1769_v27 }
 0x178   : > { %1675 = vmatmul.mubr.msk.f32.vlgmr.msra.gmra.mrb[0].mxu1 %vm654_vm2, %v727_v30  ;;  %1927 = vmatpush3.bf16.msra.mxu0 %v1926_v23  ;;  %v1677_v23 = vld [vmem:[%s2560_s10] ss:$0 sm:$0xff] }
 0x179   : > { %1951 = vmatpush3.bf16.msra.mxu1 %v1950_v24  ;;  %1928 = vmatprep.subr.bf16.mxu0 %v2094_v18 }
 0x17a   : > { %1952 = vmatprep.subr.bf16.mxu1 %v2094_v18  ;;  %1842 = vmatprep.mubr.msk.f32.mxu1 %vm2093_vm5, %v2092_v4 }
 0x17b   : > { %1807 = vmatprep.mubr.msk.f32.mxu0 %vm2093_vm5, %v2092_v4 }
 0x17c   : > { %1930 = vmatpush3.bf16.msra.mxu0 %v1929_v31 }
 0x17d   : > { %1954 = vmatpush3.bf16.msra.mxu1 %v1953_v32  ;;  %1931 = vmatprep.subr.bf16.mxu0 %v2094_v18 }
 0x17e   : > { %1955 = vmatprep.subr.bf16.mxu1 %v2094_v18 }
 0x180   : > { %1933 = vmatpush3.bf16.msra.mxu0 %v1932_v37  ;;  %v2095_v37 = vmov (!%p1680_p5), 0  }
 0x181   : > { %1957 = vmatpush3.bf16.msra.mxu1 %v1956_v38  ;;  %1934 = vmatprep.subr.bf16.mxu0 %v2094_v18  ;;  %v2096_v38 = vmov (!%p1680_p5), 0.0|0.0  }
 0x182   : > { %1958 = vmatprep.subr.bf16.mxu1 %v2094_v18  ;;  %2049 = vset.pattern.permute.xlu0 (!%p1680_p5), %v2095_v37 }
 0x183   : > { %1289 = vperm.xlu0 (!%p1680_p5), %2049, %v1286_v34  }
 0x184   : > { %1936 = vmatpush3.bf16.msra.mxu0 %v1935_v43  ;;  %v2097_v43 = vmov (!%p1680_p5), 0.0  }
 0x185   : > { %1960 = vmatpush3.bf16.msra.mxu1 %v1959_v44  ;;  %1937 = vmatprep.subr.bf16.mxu0 %v2094_v18  ;;  %v1299_v44 = vld [vmem:[%s2564_s14 + $0x20] sm:$0xff] (!%p1680_p5) }
 0x186   : > { %1961 = vmatprep.subr.bf16.mxu1 %v2094_v18  ;;  %v1980_v47 = vpack.c.bf16 (!%p1680_p5), %v1300_v45, %v1299_v44 }
 0x188   : > { %1939 = vmatpush3.bf16.msra.mxu0 %v1938_v49  ;;  %v1302_v49 = vld [vmem:[%s2564_s14 + $0x38] sm:$0xff] (!%p1680_p5) }
 0x189   : > { %1963 = vmatpush3.bf16.msra.mxu1 %v1962_v50  ;;  %1940 = vmatprep.subr.bf16.mxu0 %v2094_v18  ;;  %v1983_v50 = vpack.c.bf16 (!%p1680_p5), %v1302_v49, %v1301_v48 }
 0x18a   : > { %1964 = vmatprep.subr.bf16.mxu1 %v2094_v18 }
 0x18c   : > { %1942 = vmatpush3.bf16.msra.mxu0 %v1941_v55  ;;  %v1465_v55 = vld [vmem:[%s2566_s16 + $0x10] sm:$0xff] (!%p1680_p5) }
 0x18d   : > { %1966 = vmatpush3.bf16.msra.mxu1 %v1965_v56  ;;  %1943 = vmatprep.subr.bf16.mxu0 %v2094_v18  ;;  %v1305_v56 = vld [vmem:[%s2564_s14 + $0x50] sm:$0xff] (!%p1680_p5) }
 0x18e   : > { %1967 = vmatprep.subr.bf16.mxu1 %v2094_v18  ;;  %v1989_v61 = vpack.c.bf16 (!%p1680_p5), %v1306_v57, %v1305_v56 }
 0x190   : > { %1945 = vmatpush3.bf16.msra.mxu0 %v1944_v62  ;;  %v1467_v62 = vld [vmem:[%s2566_s16 + $0x20] sm:$0xff] (!%p1680_p5) }
 0x191   : > { %1969 = vmatpush3.bf16.msra.mxu1 %v1968_v59  ;;  %1946 = vmatprep.subr.bf16.mxu0 %v2094_v18  ;;  %v1466_v59 = vld [vmem:[%s2566_s16 + $0x18] sm:$0xff] (!%p1680_p5)  ;;  %v2004_v2 = vpack.c.bf16 (!%p1680_p5), %v1468_v63, %v1467_v62 }
 0x192   : > { %1970 = vmatprep.subr.bf16.mxu1 %v2094_v18  ;;  %v2001_v60 = vpack.c.bf16 (!%p1680_p5), %v1466_v59, %v1465_v55 }
 0x194   : > { %1948 = vmatpush3.bf16.msra.mxu0 %v1947_v6  ;;  %v1469_v6 = vld [vmem:[%s2566_s16 + $0x30] sm:$0xff] (!%p1680_p5) }
 0x195   : > { %1972 = vmatpush3.bf16.msra.mxu1 %v1971_v1  ;;  %1845 = vmatprep.subr.mxu0 %v2092_v4  ;;  %v1308_v1 = vld [vmem:[%s2564_s14 + $0x68] sm:$0xff] (!%p1680_p5)  ;;  %v2007_v10 = vpack.c.bf16 (!%p1680_p5), %v1470_v7, %v1469_v6 }
 0x196   : > { %1885 = vmatprep.subr.mxu1 (!%p1680_p5), %v2097_v43  ;;  %v1992_v3 = vpack.c.bf16 (!%p1680_p5), %v1308_v1, %v1307_v0 }
 0x24a   : > { %v979_v14 = vpop.f32.mrb[2].mxu0 }
 0x24b   : > { %v890_v15 = vpop.f32.mrb[0].mxu1  ;;  %v1774_v16 = vpop.f32.mrb[3].mxu0 }
 0x24c   : > { %v907_v17 = vadd.f32 %v900_v12, %v890_v15  ;;  %v892_v18 = vpop.f32.mrb[1].mxu1  ;;  %v1995_v12 = vpack.c.bf16 (!%p1680_p5), %v1310_v9, %v1309_v8  ;;  %v1473_v16 = vld [vmem:[%s2566_s16 + $0x50] sm:$0xff] (!%p1680_p5) }
 0x24d   : > { %v908_v19 = vadd.f32 %v904_v13, %v892_v18  ;;  %v1471_v13 = vld [vmem:[%s2566_s16 + $0x40] sm:$0xff] (!%p1680_p5) }
 0x24e   : > { %v983_v20 = vadd.f32 %v979_v14, %v907_v17  ;;  %v1472_v14 = vld [vmem:[%s2566_s16 + $0x48] sm:$0xff] (!%p1680_p5)  ;;  %v1474_v17 = vld [vmem:[%s2566_s16 + $0x58] sm:$0xff] (!%p1680_p5) }
 0x24f   : > { %v985_v21 = vmax.f32 %v908_v19, 0.0  ;;  %v2010_v15 = vpack.c.bf16 (!%p1680_p5), %v1472_v14, %v1471_v13  ;;  %v2013_v18 = vpack.c.bf16 (!%p1680_p5), %v1474_v17, %v1473_v16  ;;  %v1290_v19 = vpop.permute.xlu0 (!%p1680_p5), %1289 }
 0x250   : > { %v984_v22 = vmax.f32 %v983_v20, 0.0  ;;  %2050 = vrcp.f32 (!%p1680_p5), %v1290_v19 }
 0x251   : > { %1843 = vmatmul.mubr.f32.vlgmr.msra.gmra.mrb[2].mxu1 %v985_v21 }
 0x252   : > { %1808 = vmatmul.mubr.f32.vlgmr.msra.gmra.mrb[4].mxu0 %v984_v22  ;;  %1887 = vmatprep.mubr.msk.f32.mxu1 (!%p1680_p5), %vm2098_vm6, %v2097_v43 }
 0x253   : > { %1847 = vmatprep.mubr.msk.f32.mxu0 %vm2093_vm5, %v2092_v4  ;;  %v1173_v4 = vld [vmem:[#allocation2] sm:$0xff]  ;;  %1886 = vmatpush3.msra.mxu1 (!%p1680_p5), %v1294_v46 }
 0x254   : > { %1997 = vmatprep.subr.bf16.mxu1 (!%p1680_p5), %v2096_v38 }
 0x255   : > { %1888 = vmatmul.mubr.msk.f32.vlgmr.msra.gmra.mrb[0].mxu1 (!%p1680_p5), %vm654_vm2, %v2235_v5  ;;  %v1303_v5 = vld [vmem:[%s2564_s14 + $0x40] sm:$0xff] (!%p1680_p5) }
 0x256   : > { %1922 = vmatprep.mubr.msk.f32.mxu1 (!%p1680_p5), %vm2098_vm6, %v2097_v43  ;;  %v1986_v52 = vpack.c.bf16 (!%p1680_p5), %v1304_v51, %v1303_v5  ;;  %1999 = vmatpush3.bf16.msra.mxu1 (!%p1680_p5), %v1998_v58 }
 0x257   : > { %2000 = vmatprep.subr.bf16.mxu1 (!%p1680_p5), %v2096_v38 }
 0x25a   : > { %2002 = vmatpush3.bf16.msra.mxu1 (!%p1680_p5), %v2001_v60  ;;  %v2051_v21 = vpop.eup (!%p1680_p5), %2050 }
 0x25b   : > { %2003 = vmatprep.subr.bf16.mxu1 (!%p1680_p5), %v2096_v38 }
 0x25e   : > { %2005 = vmatpush3.bf16.msra.mxu1 (!%p1680_p5), %v2004_v2 }
 0x25f   : > { %2006 = vmatprep.subr.bf16.mxu1 (!%p1680_p5), %v2096_v38 }
 0x262   : > { %2008 = vmatpush3.bf16.msra.mxu1 (!%p1680_p5), %v2007_v10 }
 0x263   : > { %2009 = vmatprep.subr.bf16.mxu1 (!%p1680_p5), %v2096_v38 }
 0x266   : > { %2011 = vmatpush3.bf16.msra.mxu1 (!%p1680_p5), %v2010_v15 }
 0x267   : > { %2012 = vmatprep.subr.bf16.mxu1 (!%p1680_p5), %v2096_v38 }
 0x26a   : > { %2014 = vmatpush3.bf16.msra.mxu1 (!%p1680_p5), %v2013_v18 }
 0x26b   : > { %2015 = vmatprep.subr.bf16.mxu1 (!%p1680_p5), %v2096_v38 }
 0x324   : > { %v1169_v24 = vpop.f32.mrb[2].mxu1 }
 0x325   : > { %v1170_v26 = vadd.f32 %v1678_v11, %v1169_v24  ;;  %v1075_v27 = vpop.f32.mrb[4].mxu0  ;;  %v1844_v28 = vpop.f32.mrb[3].mxu1  ;;  %v1475_v24 = vld [vmem:[%s2566_s16 + $0x60] sm:$0xff] (!%p1680_p5) }
 0x326   : > { %v1076_v29 = vadd.f32 %v1677_v23, %v1075_v27  ;;  %v1809_v30 = vpop.f32.mrb[5].mxu0  ;;  %v1477_v27 = vld [vmem:[%s2566_s16 + $0x70] sm:$0xff] (!%p1680_p5)  ;;  %v1478_v28 = vld [vmem:[%s2566_s16 + $0x78] sm:$0xff] (!%p1680_p5) }
 0x327   : > { %1846 = vmatpush3.msra.mxu0 %v1170_v26 }
 0x328   : > { %1079 = vst [vmem:[%s630_s20] sm:$0xff] %v1076_v29  ;;  %1848 = vmatmul.mubr.msk.f32.vlgmr.msra.gmra.mrb[6].mxu0 %vm654_vm2, %v1190_v25  ;;  %1973 = vmatprep.subr.bf16.mxu0 (!%p1680_p5), %v2096_v38  ;;  %v1450_v11 = vpop.f32.mrb[0].mxu1 (!%p1680_p5)  ;;  %v1476_v25 = vld [vmem:[%s2566_s16 + $0x68] sm:$0xff] (!%p1680_p5)  ;;  %v2019_v29 = vpack.c.bf16 (!%p1680_p5), %v1478_v28, %v1477_v27 }
 0x329   : > { %1975 = vmatpush3.bf16.msra.mxu0 (!%p1680_p5), %v1974_v39  ;;  %1882 = vmatprep.mubr.msk.f32.mxu0 (!%p1680_p5), %vm2098_vm6, %v2097_v43  ;;  %v1889_v23 = vpop.f32.mrb[1].mxu1 (!%p1680_p5)  ;;  %v2016_v26 = vpack.c.bf16 (!%p1680_p5), %v1476_v25, %v1475_v24 }
 0x32a   : > { %1976 = vmatprep.subr.bf16.mxu0 (!%p1680_p5), %v2096_v38 }
 0x32b   : > { %2017 = vmatpush3.bf16.msra.mxu1 (!%p1680_p5), %v2016_v26 }
 0x32c   : > { %2018 = vmatprep.subr.bf16.mxu1 (!%p1680_p5), %v2096_v38 }
 0x32d   : > { %1978 = vmatpush3.bf16.msra.mxu0 (!%p1680_p5), %v1977_v42 }
 0x32e   : > { %1979 = vmatprep.subr.bf16.mxu0 (!%p1680_p5), %v2096_v38 }
 0x32f   : > { %2020 = vmatpush3.bf16.msra.mxu1 (!%p1680_p5), %v2019_v29 }
 0x331   : > { %1981 = vmatpush3.bf16.msra.mxu0 (!%p1680_p5), %v1980_v47 }
 0x332   : > { %1982 = vmatprep.subr.bf16.mxu0 (!%p1680_p5), %v2096_v38 }
 0x335   : > { %1984 = vmatpush3.bf16.msra.mxu0 (!%p1680_p5), %v1983_v50 }
 0x336   : > { %1985 = vmatprep.subr.bf16.mxu0 (!%p1680_p5), %v2096_v38 }
 0x339   : > { %1987 = vmatpush3.bf16.msra.mxu0 (!%p1680_p5), %v1986_v52 }
 0x33a   : > { %1988 = vmatprep.subr.bf16.mxu0 (!%p1680_p5), %v2096_v38 }
 0x33d   : > { %1990 = vmatpush3.bf16.msra.mxu0 (!%p1680_p5), %v1989_v61 }
 0x33e   : > { %1991 = vmatprep.subr.bf16.mxu0 (!%p1680_p5), %v2096_v38 }
 0x341   : > { %1993 = vmatpush3.bf16.msra.mxu0 (!%p1680_p5), %v1992_v3 }
 0x342   : > { %1994 = vmatprep.subr.bf16.mxu0 (!%p1680_p5), %v2096_v38 }
 0x345   : > { %1996 = vmatpush3.bf16.msra.mxu0 (!%p1680_p5), %v1995_v12 }
 0x3f8   : > { %1284 = sbr.rel (%p1680_p5) target bundleno = 1465 (0x5b9), region = 100 }
 0x3fb   : > { %v1275_v31 = vpop.f32.mrb[6].mxu0 }
 0x3fc   : > { %v1279_v32 = vadd.f32 %v1275_v31, %v1173_v4  ;;  %v1849_v33 = vpop.f32.mrb[7].mxu0  ;;  %v1682_v4 = vld [vmem:[%s2565_s15] ss:$0 sm:$0xff] (!%p1680_p5) }
 0x3fe   : > { %1280 = vst [vmem:[#allocation2] sm:$0xff] %v1279_v32 }
 0x405   : > { %v1285_v20 = vld [vmem:[#allocation2] sm:$0xff] }
 0x406   : > { %v1293_v22 = vmul.f32 %v2051_v21, %v1285_v20 }
 0x408   : > { %1883 = vmatmul.mubr.f32.vlgmr.msra.gmra.mrb[0].mxu0 %v1293_v22 }
 0x4db   : > { %v1377_v30 = vpop.f32.mrb[0].mxu0 }
 0x4dc   : > { %v1451_v31 = vadd.f32 %v1450_v11, %v1377_v30  ;;  %v1884_v32 = vpop.f32.mrb[1].mxu0 }
 0x4de   : > { %v1461_v33 = vadd.f32 %v1682_v4, %v1451_v31 }
 0x4e0   : > { %v1462_v34 = vmax.f32 %v1461_v33, 0.0 }
 0x4e2   : > { %1923 = vmatmul.mubr.f32.vlgmr.msra.gmra.mrb[2].mxu1 %v1462_v34 }
 0x5b5   : > { %v1552_v36 = vpop.f32.mrb[2].mxu1 }
 0x5b6   : > { %v1553_v37 = vadd.f32 %v1683_v35, %v1552_v36  ;;  %v1924_v38 = vpop.f32.mrb[3].mxu1 }
 0x5b8   : > { %1556 = vst [vmem:[#allocation3] sm:$0xff] %v1553_v37 }
 0x5b9 PF: > { %p2027_p6 = scmp.eq.s32.totalorder %s2206_s30, 2  ;;  %s2099_s18 = smov [#allocation3]  }
 0x5ba   : > { %s1568_s0 = sshll.u32 %s2099_s18, 4  ;;  %s1569_s0 = int_to_ptr.vmem [resolvable:$true] %s1568_s0 }
 0x5bb   : > { %s2052_s23 = scalar_lea.vmem %s1569_s0, 128  ;;  %p2059_p10 = scmp.lt.s32.totalorder %s1569_s0, %s1569_s0 }
 0x5bc   : > { %p2053_p7 = scmp.ne.s32.totalorder %s1569_s0, %s2052_s23  ;;  %p2060_p11 = scmp.lt.s32.totalorder %s2052_s23, %s2052_s23 }
 0x5be   : > { %p2054_p8 = pnand %p2053_p7, %p2027_p6  ;;  %p2061_p12 = por %p2060_p11, %p2059_p10 }
 0x5c0   : > { %p2055_p9 = pneg %p2054_p8 }
 0x5c2   : > { %p2062_p13 = pnand %p2061_p12, %p2055_p9 }
 0x5c4   : > { %2065 = shalt.err (!%p2062_p13)
}
 0x5c5   : > { %s2582_s3 = sld [smem:[#allocation11_spill]] }
 0x5cb   : > { %s2066_s26 = scalar_lea.hbm %s2582_s3, 128 }
 0x5cc   : > { %p2067_p0 = scmp.ne.s32.totalorder %s2582_s3, %s2066_s26  ;;  %p2072_p3 = scmp.lt.u32.totalorder %s2066_s26, %s2582_s3 }
 0x5ce   : > { %p2068_p1 = pnand %p2067_p0, %p2027_p6 }
 0x5d0   : > { %p2069_p2 = pneg %p2068_p1 }
 0x5d2   : > { %p2074_p4 = pnand %p2072_p3, %p2069_p2 }
 0x5d4   : > { %2077 = shalt.err (!%p2074_p4)
}
 0x5d5   : > { %2024 = dma.vmem_to_hbm [thread:$0]  (%p2027_p6), %s1569_s0, 128, %s2582_s3, [#allocation4]  }
 0x5d6   : > { %2083 = dma.done.wait (%p2027_p6), [#allocation4], 128  }
 0x5d7   : > { %2085 = vsyncadd (%p2027_p6), [#allocation4], 4294967168 }
 0x5d8 PF: > { %s2583_s22 = sld [smem:[#allocation6_spill]] }
 0x5de   : > { %s31_s0 = sadd.s32 1, %s2583_s22  }
 0x5df   : > { %p28_p5 = scmp.ge.s32.totalorder %s31_s0, 5  }
 0x5e1   :  { %30 = sbr.rel (!%p28_p5) target bundleno = 7 (0x7), region = 145 }
 0x5e8   :  { %1591 = vsyncpa [#allocation4], 1 }
 0x5e9   :  { %1593 = vsyncpa [#allocation4 + $0x1], 1 }

</bundles_post_ra>
